<compile_context>
chip_gen: v6e
topology: v6e:2x2x1
jax: 0.10.0
libtpu: 0.0.40
codegen_flags: <defaults>
</compile_context>

<pallas_src>
import functools
import math

import jax
import jax.numpy as jnp
from jax.experimental import pallas as pl
from jax.experimental.pallas import tpu as pltpu


# ------------------------------ tiling helpers ------------------------------

def _pick_tile(dim, prefs):
    """Largest preferred tile that divides `dim`, else the full dim (small cases)."""
    for p in prefs:
        if dim % p == 0:
            return p
    return dim


def _round_up(x, m):
    return ((x + m - 1) // m) * m


def _attn_tiles(S):
    """Return (S_pad, tile_q, tile_kv); tq decoupled from tkv."""
    if S % 128 == 0:
        tkv = 128
        tq = 256 if S % 256 == 0 else 128
        return S, tq, tkv
    if S <= 128:
        # Tiny sequence: one full-extent tile (full-dim blocks always satisfy
        # the (8,128) block constraint).
        return S, S, S
    # Large, non-aligned S: pad so all stores stay lane-dense and VMEM bounded.
    S_pad = _round_up(S, 256)
    return S_pad, 256, 128


# ----------------------- fused QKV projection kernel -----------------------

def _qkv_proj_kernel(x_ref, wq_ref, wk_ref, wv_ref, b_ref,
                     q_ref, k_ref, v_ref, q_acc, k_acc, v_acc, *, q_scale):
    kk = pl.program_id(2)

    @pl.when(kk == 0)
    def _():
        q_acc[...] = jnp.zeros_like(q_acc)
        k_acc[...] = jnp.zeros_like(k_acc)
        v_acc[...] = jnp.zeros_like(v_acc)

    x = x_ref[...]                                  # (tm, tk) bf16, read once
    q_acc[...] += jnp.dot(x, wq_ref[...], preferred_element_type=jnp.float32)
    k_acc[...] += jnp.dot(x, wk_ref[...], preferred_element_type=jnp.float32)
    v_acc[...] += jnp.dot(x, wv_ref[...], preferred_element_type=jnp.float32)

    @pl.when(kk == pl.num_programs(2) - 1)
    def _():
        b = b_ref[...]                              # (3, tn) f32
        # 1/sqrt(d_head) folded into q here (hidden under the store epilogue),
        # so the attention kernel never re-scales per kv step.
        q_ref[...] = ((q_acc[...] + b[0:1, :]) * q_scale).astype(q_ref.dtype)
        k_ref[...] = (k_acc[...] + b[1:2, :]).astype(k_ref.dtype)
        v_ref[...] = (v_acc[...] + b[2:3, :]).astype(v_ref.dtype)


def qkv_projection(x2d, wq, wk, wv, b_qkv, q_scale):
    """x2d: (M, Din) bf16, w*: (Din, D) bf16, b_qkv: (3, D) f32 -> 3x (M, D) bf16."""
    M, Din = x2d.shape
    Dout = wq.shape[1]
    tm = _pick_tile(M, (512, 256, 128))
    tn = _pick_tile(Dout, (256, 128))
    tk = _pick_tile(Din, (512, 256, 128))
    w_spec = pl.BlockSpec((tk, tn), lambda i, j, k: (k, j))
    out_spec = pl.BlockSpec((tm, tn), lambda i, j, k: (i, j))
    return pl.pallas_call(
        functools.partial(_qkv_proj_kernel, q_scale=q_scale),
        out_shape=[jax.ShapeDtypeStruct((M, Dout), jnp.bfloat16)] * 3,
        grid=(M // tm, Dout // tn, Din // tk),
        in_specs=[
            pl.BlockSpec((tm, tk), lambda i, j, k: (i, k)),
            w_spec, w_spec, w_spec,
            pl.BlockSpec((3, tn), lambda i, j, k: (0, j)),
        ],
        out_specs=[out_spec] * 3,
        scratch_shapes=[pltpu.VMEM((tm, tn), jnp.float32)] * 3,
        compiler_params=pltpu.CompilerParams(
            dimension_semantics=("parallel", "parallel", "arbitrary")),
    )(x2d, wq, wk, wv, b_qkv)


# ------------------------- output projection kernel -------------------------

def _linear_kernel(x_ref, w_ref, b_ref, o_ref, acc_ref):
    kk = pl.program_id(2)

    @pl.when(kk == 0)
    def _():
        acc_ref[...] = jnp.zeros_like(acc_ref)

    acc_ref[...] += jnp.dot(x_ref[...], w_ref[...],
                            preferred_element_type=jnp.float32)

    @pl.when(kk == pl.num_programs(2) - 1)
    def _():
        o_ref[...] = (acc_ref[...] + b_ref[...]).astype(o_ref.dtype)


def linear(x2d, w, b, out_dtype=jnp.float32):
    """y = x2d @ w + b. x2d: (M, Din) bf16, w: (Din, Dout) bf16, b: (Dout,) f32."""
    M, Din = x2d.shape
    Dout = w.shape[1]
    tm = _pick_tile(M, (512, 256, 128))
    tn = _pick_tile(Dout, (256, 128))
    tk = _pick_tile(Din, (512, 256, 128))
    return pl.pallas_call(
        _linear_kernel,
        out_shape=jax.ShapeDtypeStruct((M, Dout), out_dtype),
        grid=(M // tm, Dout // tn, Din // tk),
        in_specs=[
            pl.BlockSpec((tm, tk), lambda i, j, k: (i, k)),
            pl.BlockSpec((tk, tn), lambda i, j, k: (k, j)),
            pl.BlockSpec((1, tn), lambda i, j, k: (0, j)),
        ],
        out_specs=pl.BlockSpec((tm, tn), lambda i, j, k: (i, j)),
        scratch_shapes=[pltpu.VMEM((tm, tn), jnp.float32)],
        compiler_params=pltpu.CompilerParams(
            dimension_semantics=("parallel", "parallel", "arbitrary")),
    )(x2d, w, b.reshape(1, Dout))


# ------------------------ flash-style causal attention -----------------------

def _flash_attn_kernel(q_ref, k_ref, v_ref, o_ref, m_ref, l_ref, acc_ref,
                       *, tq, tkv, r):
    qi = pl.program_id(2)
    ki = pl.program_id(3)

    @pl.when(ki == 0)
    def _():
        m_ref[...] = jnp.full_like(m_ref, -1e30)
        l_ref[...] = jnp.zeros_like(l_ref)
        acc_ref[...] = jnp.zeros_like(acc_ref)

    # First kv-tile index that straddles the causal diagonal for this q tile.
    diag_lo = qi * r

    def scores():
        # q already carries 1/sqrt(d_head); contraction on last dims (no k^T).
        return jax.lax.dot_general(
            q_ref[0, 0], k_ref[0, 0],
            dimension_numbers=(((1,), (1,)), ((), ())),
            preferred_element_type=jnp.float32)          # (tq, tkv) f32

    def online_update(s):
        v = v_ref[0, 0]
        m_prev = m_ref[...]                              # (tq, 1)
        m_new = jnp.maximum(m_prev, jnp.max(s, axis=-1, keepdims=True))
        alpha = jnp.exp(m_prev - m_new)
        p = jnp.exp(s - m_new)                           # f32 softmax math
        l_ref[...] = alpha * l_ref[...] + jnp.sum(p, axis=-1, keepdims=True)
        acc_ref[...] = alpha * acc_ref[...] + jnp.dot(
            p.astype(v.dtype), v, preferred_element_type=jnp.float32)
        m_ref[...] = m_new

    # Interior kv tiles (fully below the diagonal): no mask work at all.
    @pl.when(ki < diag_lo)
    def _():
        online_update(scores())

    # Diagonal-band kv tiles: build + apply the causal mask only here.
    @pl.when(jnp.logical_and(ki >= diag_lo, ki < diag_lo + r))
    def _():
        s = scores()
        row = qi * tq + jax.lax.broadcasted_iota(jnp.int32, (tq, tkv), 0)
        col = ki * tkv + jax.lax.broadcasted_iota(jnp.int32, (tq, tkv), 1)
        s = jnp.where(row >= col, s, -1e30)              # finite mask value (NaN-safe)
        online_update(s)

    # Tiles with ki >= diag_lo + r lie entirely above the diagonal: skipped
    # (and their DMA was deduped by the clamped kv index_map).

    @pl.when(ki == pl.num_programs(3) - 1)
    def _():
        inv_l = pl.reciprocal(l_ref[...], approx=True)   # EUP slot, not VALU divide
        o_ref[0, 0] = (acc_ref[...] * inv_l).astype(o_ref.dtype)


def causal_attention(q4, k4, v4, tq, tkv):
    """q4,k4,v4: (B, H, S_pad, d_head) bf16 (q pre-scaled) -> (B, H, S_pad, d_head) bf16."""
    B, H, S_pad, dh = q4.shape
    n_q = S_pad // tq
    n_kv = S_pad // tkv
    r = tq // tkv

    q_spec = pl.BlockSpec((1, 1, tq, dh), lambda b, h, qi, ki: (b, h, qi, 0))
    # Clamp the kv block index so fully-masked tiles re-request the already
    # resident block -> Pallas dedupes the DMA (no HBM traffic for them).
    kv_spec = pl.BlockSpec(
        (1, 1, tkv, dh),
        lambda b, h, qi, ki: (b, h, jnp.minimum(ki, (qi + 1) * r - 1), 0))

    return pl.pallas_call(
        functools.partial(_flash_attn_kernel, tq=tq, tkv=tkv, r=r),
        out_shape=jax.ShapeDtypeStruct((B, H, S_pad, dh), jnp.bfloat16),
        grid=(B, H, n_q, n_kv),
        in_specs=[q_spec, kv_spec, kv_spec],
        out_specs=pl.BlockSpec((1, 1, tq, dh), lambda b, h, qi, ki: (b, h, qi, 0)),
        scratch_shapes=[
            pltpu.VMEM((tq, 1), jnp.float32),    # running max
            pltpu.VMEM((tq, 1), jnp.float32),    # running denominator
            pltpu.VMEM((tq, dh), jnp.float32),   # running accumulator
        ],
        # Tiles are capped at (tq=256, tkv=128) so double-buffered blocks +
        # scratch stay comfortably inside the default scoped-VMEM budget
        # (also on v7x's 64 MiB VMEM).
        compiler_params=pltpu.CompilerParams(
            dimension_semantics=("parallel", "parallel", "parallel", "arbitrary")),
    )(q4, k4, v4)


# -------------------------------- module glue --------------------------------

def init_params(key, d_model):
    """Deterministic parameter init (PyTorch nn.Linear-style uniform), f32."""
    bound = 1.0 / math.sqrt(d_model)
    keys = jax.random.split(key, 8)

    def lin(kw, kb):
        w = jax.random.uniform(kw, (d_model, d_model), jnp.float32, -bound, bound)
        b = jax.random.uniform(kb, (d_model,), jnp.float32, -bound, bound)
        return w, b

    wq, bq = lin(keys[0], keys[1])
    wk, bk = lin(keys[2], keys[3])
    wv, bv = lin(keys[4], keys[5])
    wo, bo = lin(keys[6], keys[7])
    return dict(wq=wq, bq=bq, wk=wk, bk=bk, wv=wv, bv=bv, wo=wo, bo=bo)


def causal_self_attention(params, x, head):
    """Forward pass of CasualSelfAttention. x: (B, S, D) f32 -> (B, S, D) f32."""
    B, S, D = x.shape
    d_head = D // head

    # Sequence padding so attention tiles are 128-aligned (lane-dense stores,
    # bounded VMEM).  Padded key columns are removed by the causal mask; padded
    # query rows are sliced off at the end.
    S_pad, tq, tkv = _attn_tiles(S)
    if S_pad != S:
        x = jnp.pad(x, ((0, 0), (0, S_pad - S), (0, 0)))
    M = B * S_pad

    # bf16 at the MXU boundary; f32 accumulation / softmax inside the kernels.
    x2d = x.reshape(M, D).astype(jnp.bfloat16)
    wq = params["wq"].astype(jnp.bfloat16)
    wk = params["wk"].astype(jnp.bfloat16)
    wv = params["wv"].astype(jnp.bfloat16)
    b_qkv = jnp.stack([params["bq"], params["bk"], params["bv"]])  # (3, D) f32

    # Fused Q/K/V projection: one pallas_call, x read once per tile, q pre-scaled.
    q, k, v = qkv_projection(x2d, wq, wk, wv, b_qkv,
                             q_scale=1.0 / math.sqrt(float(d_head)))

    # Heads on a parallel grid axis: (B, H, S_pad, d_head).
    def to_heads(t):
        return t.reshape(B, S_pad, head, d_head).transpose(0, 2, 1, 3)

    attn4 = causal_attention(to_heads(q), to_heads(k), to_heads(v), tq, tkv)
    # TODO(synk): nn.Dropout on the attention weights omitted (eval semantics).

    # Back to concat layout (B, S_pad, D) for the output projection.
    attn2d = attn4.transpose(0, 2, 1, 3).reshape(M, D)

    wo = params["wo"].astype(jnp.bfloat16)
    out = linear(attn2d, wo, params["bo"], out_dtype=jnp.float32)
    out = out.reshape(B, S_pad, D)
    return out[:, :S, :] if S_pad != S else out


# ------------------------------------ main ------------------------------------

if __name__ == "__main__":
    B, S, D, H = 2, 8, 32, 4   # batch, sentence_length, d_model, head

    key = jax.random.PRNGKey(0)
    k_param, k_x = jax.random.split(key)
    params = init_params(k_param, D)
    x = jax.random.normal(k_x, (B, S, D), dtype=jnp.float32)

    out = causal_self_attention(params, x, H)
    out = jax.block_until_ready(out)

    assert out.shape == (B, S, D)
    assert bool(jnp.all(jnp.isfinite(out)))
    print("KERNEL_OK")
</pallas_src>

<mosaic_0001>
module attributes {stable_mosaic.version = 11 : i64} {
  func.func @_qkv_proj_kernel(%arg0: i32, %arg1: i32, %arg2: i32, %arg3: memref<16x32xbf16, #tpu.memory_space<vmem>>, %arg4: memref<32x32xbf16, #tpu.memory_space<vmem>>, %arg5: memref<32x32xbf16, #tpu.memory_space<vmem>>, %arg6: memref<32x32xbf16, #tpu.memory_space<vmem>>, %arg7: memref<3x32xf32, #tpu.memory_space<vmem>>, %arg8: memref<16x32xbf16, #tpu.memory_space<vmem>>, %arg9: memref<16x32xbf16, #tpu.memory_space<vmem>>, %arg10: memref<16x32xbf16, #tpu.memory_space<vmem>>, %arg11: memref<16x32xf32, #tpu.memory_space<vmem>>, %arg12: memref<16x32xf32, #tpu.memory_space<vmem>>, %arg13: memref<16x32xf32, #tpu.memory_space<vmem>>) attributes {dimension_semantics = [#tpu.dimension_semantics<parallel>, #tpu.dimension_semantics<parallel>, #tpu.dimension_semantics<arbitrary>], iteration_bounds = array<i64: 1, 1, 1>, scalar_prefetch = 0 : i64, scratch_operands = 3 : i64, tpu.core_type = #tpu.core_type<tc>, window_params = [{transform_indices = @transform_0, window_bounds = array<i64: 16, 32>}, {transform_indices = @transform_1, window_bounds = array<i64: 32, 32>}, {transform_indices = @transform_2, window_bounds = array<i64: 32, 32>}, {transform_indices = @transform_3, window_bounds = array<i64: 32, 32>}, {transform_indices = @transform_4, window_bounds = array<i64: 3, 32>}, {transform_indices = @transform_5, window_bounds = array<i64: 16, 32>}, {transform_indices = @transform_6, window_bounds = array<i64: 16, 32>}, {transform_indices = @transform_7, window_bounds = array<i64: 16, 32>}]} {
    %c0_i32 = arith.constant 0 : i32
    %0 = arith.cmpi eq, %arg2, %c0_i32 : i32
    %1 = arith.extui %0 : i1 to i32
    %c0_i32_0 = arith.constant 0 : i32
    %2 = arith.cmpi ne, %1, %c0_i32_0 : i32
    scf.if %2 {
      %cst_24 = arith.constant 0.000000e+00 : f32
      %22 = vector.broadcast %cst_24 : f32 to vector<16x32xf32>
      %c0_25 = arith.constant 0 : index
      %c0_26 = arith.constant 0 : index
      %23 = vector.load %arg11[%c0_25, %c0_26] : memref<16x32xf32, #tpu.memory_space<vmem>>, vector<16x32xf32>
      tpu.vector_store %arg11[%c0_25, %c0_26], %22 {strides = array<i32>} : memref<16x32xf32, #tpu.memory_space<vmem>>, vector<16x32xf32>,
      %cst_27 = arith.constant 0.000000e+00 : f32
      %24 = vector.broadcast %cst_27 : f32 to vector<16x32xf32>
      %c0_28 = arith.constant 0 : index
      %c0_29 = arith.constant 0 : index
      %25 = vector.load %arg12[%c0_28, %c0_29] : memref<16x32xf32, #tpu.memory_space<vmem>>, vector<16x32xf32>
      tpu.vector_store %arg12[%c0_28, %c0_29], %24 {strides = array<i32>} : memref<16x32xf32, #tpu.memory_space<vmem>>, vector<16x32xf32>,
      %cst_30 = arith.constant 0.000000e+00 : f32
      %26 = vector.broadcast %cst_30 : f32 to vector<16x32xf32>
      %c0_31 = arith.constant 0 : index
      %c0_32 = arith.constant 0 : index
      %27 = vector.load %arg13[%c0_31, %c0_32] : memref<16x32xf32, #tpu.memory_space<vmem>>, vector<16x32xf32>
      tpu.vector_store %arg13[%c0_31, %c0_32], %26 {strides = array<i32>} : memref<16x32xf32, #tpu.memory_space<vmem>>, vector<16x32xf32>,
    } else {
    }
    %c0 = arith.constant 0 : index
    %c0_1 = arith.constant 0 : index
    %3 = vector.load %arg3[%c0, %c0_1] : memref<16x32xbf16, #tpu.memory_space<vmem>>, vector<16x32xbf16>
    %c0_2 = arith.constant 0 : index
    %c0_3 = arith.constant 0 : index
    %4 = vector.load %arg11[%c0_2, %c0_3] : memref<16x32xf32, #tpu.memory_space<vmem>>, vector<16x32xf32>
    %c0_4 = arith.constant 0 : index
    %c0_5 = arith.constant 0 : index
    %5 = vector.load %arg4[%c0_4, %c0_5] : memref<32x32xbf16, #tpu.memory_space<vmem>>, vector<32x32xbf16>
    %cst = arith.constant dense<0.000000e+00> : vector<16x32xf32>
    %6 = tpu.matmul %3, %5, %cst {dimension_numbers = #tpu.dot_dimension_numbers<[1], [0], [0], [1], [0, 0, 1, 1], [], []>} : vector<16x32xbf16>, vector<32x32xbf16>, vector<16x32xf32> -> vector<16x32xf32>
    %7 = arith.addf %4, %6 : vector<16x32xf32>
    %c0_6 = arith.constant 0 : index
    %c0_7 = arith.constant 0 : index
    %8 = vector.load %arg11[%c0_6, %c0_7] : memref<16x32xf32, #tpu.memory_space<vmem>>, vector<16x32xf32>
    tpu.vector_store %arg11[%c0_6, %c0_7], %7 {strides = array<i32>} : memref<16x32xf32, #tpu.memory_space<vmem>>, vector<16x32xf32>,
    %c0_8 = arith.constant 0 : index
    %c0_9 = arith.constant 0 : index
    %9 = vector.load %arg12[%c0_8, %c0_9] : memref<16x32xf32, #tpu.memory_space<vmem>>, vector<16x32xf32>
    %c0_10 = arith.constant 0 : index
    %c0_11 = arith.constant 0 : index
    %10 = vector.load %arg5[%c0_10, %c0_11] : memref<32x32xbf16, #tpu.memory_space<vmem>>, vector<32x32xbf16>
    %cst_12 = arith.constant dense<0.000000e+00> : vector<16x32xf32>
    %11 = tpu.matmul %3, %10, %cst_12 {dimension_numbers = #tpu.dot_dimension_numbers<[1], [0], [0], [1], [0, 0, 1, 1], [], []>} : vector<16x32xbf16>, vector<32x32xbf16>, vector<16x32xf32> -> vector<16x32xf32>
    %12 = arith.addf %9, %11 : vector<16x32xf32>
    %c0_13 = arith.constant 0 : index
    %c0_14 = arith.constant 0 : index
    %13 = vector.load %arg12[%c0_13, %c0_14] : memref<16x32xf32, #tpu.memory_space<vmem>>, vector<16x32xf32>
    tpu.vector_store %arg12[%c0_13, %c0_14], %12 {strides = array<i32>} : memref<16x32xf32, #tpu.memory_space<vmem>>, vector<16x32xf32>,
    %c0_15 = arith.constant 0 : index
    %c0_16 = arith.constant 0 : index
    %14 = vector.load %arg13[%c0_15, %c0_16] : memref<16x32xf32, #tpu.memory_space<vmem>>, vector<16x32xf32>
    %c0_17 = arith.constant 0 : index
    %c0_18 = arith.constant 0 : index
    %15 = vector.load %arg6[%c0_17, %c0_18] : memref<32x32xbf16, #tpu.memory_space<vmem>>, vector<32x32xbf16>
    %cst_19 = arith.constant dense<0.000000e+00> : vector<16x32xf32>
    %16 = tpu.matmul %3, %15, %cst_19 {dimension_numbers = #tpu.dot_dimension_numbers<[1], [0], [0], [1], [0, 0, 1, 1], [], []>} : vector<16x32xbf16>, vector<32x32xbf16>, vector<16x32xf32> -> vector<16x32xf32>
    %17 = arith.addf %14, %16 : vector<16x32xf32>
    %c0_20 = arith.constant 0 : index
    %c0_21 = arith.constant 0 : index
    %18 = vector.load %arg13[%c0_20, %c0_21] : memref<16x32xf32, #tpu.memory_space<vmem>>, vector<16x32xf32>
    tpu.vector_store %arg13[%c0_20, %c0_21], %17 {strides = array<i32>} : memref<16x32xf32, #tpu.memory_space<vmem>>, vector<16x32xf32>,
    %c0_i32_22 = arith.constant 0 : i32
    %19 = arith.cmpi eq, %arg2, %c0_i32_22 : i32
    %20 = arith.extui %19 : i1 to i32
    %c0_i32_23 = arith.constant 0 : i32
    %21 = arith.cmpi ne, %20, %c0_i32_23 : i32
    scf.if %21 {
      %c0_24 = arith.constant 0 : index
      %c0_25 = arith.constant 0 : index
      %22 = vector.load %arg7[%c0_24, %c0_25] : memref<3x32xf32, #tpu.memory_space<vmem>>, vector<3x32xf32>
      %c0_26 = arith.constant 0 : index
      %c0_27 = arith.constant 0 : index
      %23 = vector.load %arg11[%c0_26, %c0_27] : memref<16x32xf32, #tpu.memory_space<vmem>>, vector<16x32xf32>
      %24 = vector.extract_strided_slice %22 {offsets = [0, 0], sizes = [1, 32], strides = [1, 1]} : vector<3x32xf32> to vector<1x32xf32>
      %25 = vector.broadcast %24 : vector<1x32xf32> to vector<16x32xf32>
      %26 = arith.addf %23, %25 : vector<16x32xf32>
      %cst_28 = arith.constant 0.353553385 : f32
      %27 = vector.broadcast %cst_28 : f32 to vector<16x32xf32>
      %28 = arith.mulf %26, %27 : vector<16x32xf32>
      %29 = arith.truncf %28 : vector<16x32xf32> to vector<16x32xbf16>
      %c0_29 = arith.constant 0 : index
      %c0_30 = arith.constant 0 : index
      %30 = vector.load %arg8[%c0_29, %c0_30] : memref<16x32xbf16, #tpu.memory_space<vmem>>, vector<16x32xbf16>
      tpu.vector_store %arg8[%c0_29, %c0_30], %29 {strides = array<i32>} : memref<16x32xbf16, #tpu.memory_space<vmem>>, vector<16x32xbf16>,
      %c0_31 = arith.constant 0 : index
      %c0_32 = arith.constant 0 : index
      %31 = vector.load %arg12[%c0_31, %c0_32] : memref<16x32xf32, #tpu.memory_space<vmem>>, vector<16x32xf32>
      %32 = vector.extract_strided_slice %22 {offsets = [1, 0], sizes = [1, 32], strides = [1, 1]} : vector<3x32xf32> to vector<1x32xf32>
      %33 = vector.broadcast %32 : vector<1x32xf32> to vector<16x32xf32>
      %34 = arith.addf %31, %33 : vector<16x32xf32>
      %35 = arith.truncf %34 : vector<16x32xf32> to vector<16x32xbf16>
      %c0_33 = arith.constant 0 : index
      %c0_34 = arith.constant 0 : index
      %36 = vector.load %arg9[%c0_33, %c0_34] : memref<16x32xbf16, #tpu.memory_space<vmem>>, vector<16x32xbf16>
      tpu.vector_store %arg9[%c0_33, %c0_34], %35 {strides = array<i32>} : memref<16x32xbf16, #tpu.memory_space<vmem>>, vector<16x32xbf16>,
      %c0_35 = arith.constant 0 : index
      %c0_36 = arith.constant 0 : index
      %37 = vector.load %arg13[%c0_35, %c0_36] : memref<16x32xf32, #tpu.memory_space<vmem>>, vector<16x32xf32>
      %38 = vector.extract_strided_slice %22 {offsets = [2, 0], sizes = [1, 32], strides = [1, 1]} : vector<3x32xf32> to vector<1x32xf32>
      %39 = vector.broadcast %38 : vector<1x32xf32> to vector<16x32xf32>
      %40 = arith.addf %37, %39 : vector<16x32xf32>
      %41 = arith.truncf %40 : vector<16x32xf32> to vector<16x32xbf16>
      %c0_37 = arith.constant 0 : index
      %c0_38 = arith.constant 0 : index
      %42 = vector.load %arg10[%c0_37, %c0_38] : memref<16x32xbf16, #tpu.memory_space<vmem>>, vector<16x32xbf16>
      tpu.vector_store %arg10[%c0_37, %c0_38], %41 {strides = array<i32>} : memref<16x32xbf16, #tpu.memory_space<vmem>>, vector<16x32xbf16>,
    } else {
    }
    return
  }
  func.func @transform_0(%arg0: i32, %arg1: i32, %arg2: i32) -> (i32, i32) {
    %c0_i32 = arith.constant 0 : i32
    return %arg0, %arg2 : i32, i32
  }
  func.func @transform_1(%arg0: i32, %arg1: i32, %arg2: i32) -> (i32, i32) {
    %c0_i32 = arith.constant 0 : i32
    return %arg2, %arg1 : i32, i32
  }
  func.func @transform_2(%arg0: i32, %arg1: i32, %arg2: i32) -> (i32, i32) {
    %c0_i32 = arith.constant 0 : i32
    return %arg2, %arg1 : i32, i32
  }
  func.func @transform_3(%arg0: i32, %arg1: i32, %arg2: i32) -> (i32, i32) {
    %c0_i32 = arith.constant 0 : i32
    return %arg2, %arg1 : i32, i32
  }
  func.func @transform_4(%arg0: i32, %arg1: i32, %arg2: i32) -> (i32, i32) {
    %c0_i32 = arith.constant 0 : i32
    %c0_i32_0 = arith.constant 0 : i32
    return %c0_i32, %arg1 : i32, i32
  }
  func.func @transform_5(%arg0: i32, %arg1: i32, %arg2: i32) -> (i32, i32) {
    %c0_i32 = arith.constant 0 : i32
    return %arg0, %arg1 : i32, i32
  }
  func.func @transform_6(%arg0: i32, %arg1: i32, %arg2: i32) -> (i32, i32) {
    %c0_i32 = arith.constant 0 : i32
    return %arg0, %arg1 : i32, i32
  }
  func.func @transform_7(%arg0: i32, %arg1: i32, %arg2: i32) -> (i32, i32) {
    %c0_i32 = arith.constant 0 : i32
    return %arg0, %arg1 : i32, i32
  }
}

</mosaic_0001>

<bundles_post_ra>
// kernel: tpu_custom_call.1
= control target key start
LH: loop header
LB: loop body
LE: loop exit
PB: predicated region body
PF: predicated region fallthrough
CT: control target
= control target key end

     0   :  { %13 = vsyncpa [#allocation6], 0  ;;  %s746_s0 = inlined_call_operand.hbm [shape: bf16[16,32], index: 0, kind: input, shape index: {}]   ;;  %s747_s1 = inlined_call_operand.hbm [shape: bf16[32,32], index: 1, kind: input, shape index: {}]   ;;  %s748_s2 = inlined_call_operand.hbm [shape: bf16[32,32], index: 2, kind: input, shape index: {}]   ;;  %s749_s3 = inlined_call_operand.hbm [shape: bf16[32,32], index: 3, kind: input, shape index: {}]   ;;  %s750_s4 = inlined_call_operand.vmem [shape: f32[3,32], index: 4, kind: input, shape index: {}]   ;;  %s751_s5 = inlined_call_operand.hbm [shape: bf16[16,32], index: 5, kind: output, shape index: {0}]   ;;  %s752_s6 = inlined_call_operand.hbm [shape: bf16[16,32], index: 6, kind: output, shape index: {1}]   ;;  %s753_s7 = inlined_call_operand.hbm [shape: bf16[16,32], index: 7, kind: output, shape index: {2}]  }
   0x1   :  { %14 = vsyncpa [#allocation9], 0 }
   0x2   :  { %15 = vsyncpa [#allocation12], 0 }
   0x3   :  { %16 = vsyncpa [#allocation7], 0 }
   0x4   :  { %17 = vsyncpa [#allocation15], 0  ;;  %s626_s24 = smov [#allocation8]   ;;  %s627_s26 = smov [#allocation5]  }
   0x5   :  { %s35_s25 = sshll.u32 %s626_s24, 4  ;;  %s23_s27 = sshll.u32 %s627_s26, 4  ;;  %s36_s25 = int_to_ptr.vmem [resolvable:$true] %s35_s25  ;;  %s24_s27 = int_to_ptr.vmem [resolvable:$true] %s23_s27 }
   0x6   :  { %s484_s28 = scalar_lea.vmem %s36_s25, 256  ;;  %p489_p1 = scmp.lt.s32.totalorder %s36_s25, %s36_s25 }
   0x7   :  { %p485_p0 = scmp.ne.s32.totalorder %s36_s25, %s484_s28  ;;  %p490_p2 = scmp.lt.s32.totalorder %s484_s28, %s484_s28 }
   0x9   :  { %p491_p3 = por %p490_p2, %p489_p1 }
   0xb   :  { %p492_p4 = pnand %p491_p3, %p485_p0 }
   0xd   :  { %495 = shalt.err (!%p492_p4)
}
   0xe   :  { %s628_s29 = smov 64   ;;  %s629_s30 = smov 4  }
   0xf   :  { %41 = dma.hbm_to_vmem [thread:$0]  %s747_s1, 256, %s36_s25, [#allocation9], %s628_s29, %s628_s29, %s629_s30  }
  0x10   :  { %s504_s10 = scalar_lea.vmem %s24_s27, 128  ;;  %p509_p6 = scmp.lt.s32.totalorder %s24_s27, %s24_s27 }
  0x11   :  { %p505_p5 = scmp.ne.s32.totalorder %s24_s27, %s504_s10  ;;  %p510_p7 = scmp.lt.s32.totalorder %s504_s10, %s504_s10 }
  0x13   :  { %p511_p8 = por %p510_p7, %p509_p6 }
  0x15   :  { %p512_p9 = pnand %p511_p8, %p505_p5 }
  0x17   :  { %515 = shalt.err (!%p512_p9)
}
  0x18   :  { %29 = dma.hbm_to_vmem [thread:$0]  %s746_s0, 128, %s24_s27, [#allocation6], %s628_s29, %s628_s29, %s629_s30  }
  0x19   :  { %s630_s13 = smov [#allocation10]   ;;  %s631_s15 = smov [#allocation11]  }
  0x1a   :  { %s47_s14 = sshll.u32 %s630_s13, 4  ;;  %s59_s16 = sshll.u32 %s631_s15, 4  ;;  %s48_s14 = int_to_ptr.vmem [resolvable:$true] %s47_s14  ;;  %s60_s16 = int_to_ptr.vmem [resolvable:$true] %s59_s16 }
  0x1b   :  { %s524_s1 = scalar_lea.vmem %s48_s14, 256  ;;  %p529_p11 = scmp.lt.s32.totalorder %s48_s14, %s48_s14 }
  0x1c   :  { %p525_p10 = scmp.ne.s32.totalorder %s48_s14, %s524_s1  ;;  %p530_p12 = scmp.lt.s32.totalorder %s524_s1, %s524_s1 }
  0x1e   :  { %p531_p13 = por %p530_p12, %p529_p11 }
  0x20   :  { %p532_p0 = pnand %p531_p13, %p525_p10 }
  0x22   :  { %535 = shalt.err (!%p532_p0)
}
  0x23   :  { %53 = dma.hbm_to_vmem [thread:$0]  %s748_s2, 256, %s48_s14, [#allocation9], %s628_s29, %s628_s29, %s629_s30  }
  0x24   :  { %s544_s0 = scalar_lea.vmem %s60_s16, 256  ;;  %p549_p2 = scmp.lt.s32.totalorder %s60_s16, %s60_s16 }
  0x25   :  { %p545_p1 = scmp.ne.s32.totalorder %s60_s16, %s544_s0  ;;  %p550_p3 = scmp.lt.s32.totalorder %s544_s0, %s544_s0 }
  0x27   :  { %p551_p4 = por %p550_p3, %p549_p2 }
  0x29   :  { %p552_p5 = pnand %p551_p4, %p545_p1 }
  0x2b   :  { %555 = shalt.err (!%p552_p5)
}
  0x2c   :  { %65 = dma.hbm_to_vmem [thread:$0]  %s749_s3, 256, %s60_s16, [#allocation12], %s628_s29, %s628_s29, %s629_s30  }
  0x2d   :  { %616 = dma.done.wait [#allocation6], 128  }
  0x2e   :  { %617 = vsyncadd [#allocation6], 4294967168 }
  0x2f   :  { %618 = dma.done.wait [#allocation9], 512  }
  0x30   :  { %619 = vsyncadd [#allocation9], 4294966784 }
  0x31   :  { %620 = dma.done.wait [#allocation12], 256  }
  0x32   :  { %621 = vsyncadd [#allocation12], 4294967040  ;;  %vm85_vm0 = vcmask 261120   ;;  %v632_v0 = vmov 0.0   ;;  %vm633_vm1 = vmmov 0   ;;  %v469_v1 = vld [vmem:[#allocation8 + $0x8] sm:$0xff]   ;;  %v298_v8 = vlaneseq }
  0x33   :  { %434 = vmatprep.subr.bf16.mxu0 %v632_v0  ;;  %442 = vmatprep.subr.bf16.mxu1 %v632_v0  ;;  %86 = vst.msk [vmem:[#allocation2] sm:$0xff] %vm85_vm0, %v632_v0  ;;  %87 = vst.msk [vmem:[#allocation2 + $0x8] sm:$0xff] %vm85_vm0, %v632_v0  ;;  %v470_v2 = vld [vmem:[#allocation10 + $0x8] sm:$0xff]   ;;  %v471_v3 = vld [vmem:[#allocation8] sm:$0xff]   ;;  %vm314_vm2 = vcmask 257024   ;;  %s635_s22 = smov [#allocation13]  }
  0x34   :  { %88 = vst.msk [vmem:[#allocation3] sm:$0xff] %vm85_vm0, %v632_v0  ;;  %89 = vst.msk [vmem:[#allocation3 + $0x8] sm:$0xff] %vm85_vm0, %v632_v0  ;;  %438 = vmatprep.mubr.msk.bf16.mxu0 %vm633_vm1, %v632_v0  ;;  %446 = vmatprep.mubr.msk.bf16.mxu1 %vm633_vm1, %v632_v0  ;;  %v472_v4 = vld [vmem:[#allocation10] sm:$0xff]   ;;  %v473_v5 = vld [vmem:[#allocation5] sm:$0xff]   ;;  %v299_v11 = vshrl.u32 %v298_v8, 7  ;;  %s358_s23 = sshll.u32 %s635_s22, 4  ;;  %s359_s23 = int_to_ptr.vmem [resolvable:$true] %s358_s23 }
  0x35   :  { %90 = vst.msk [vmem:[#allocation4] sm:$0xff] %vm85_vm0, %v632_v0  ;;  %91 = vst.msk [vmem:[#allocation4 + $0x8] sm:$0xff] %vm85_vm0, %v632_v0  ;;  %435 = vmatpush3.bf16.msra.mxu0 %v469_v1  ;;  %443 = vmatpush3.bf16.msra.mxu1 %v470_v2  ;;  %v474_v6 = vld [vmem:[#allocation11 + $0x8] sm:$0xff]   ;;  %v475_v7 = vld [vmem:[#allocation11] sm:$0xff]   ;;  %s636_s24 = smov [#allocation16]  }
  0x36   :  { %436 = vmatprep.subr.bf16.mxu0 %v632_v0  ;;  %444 = vmatprep.subr.bf16.mxu1 %v632_v0  ;;  %v300_v20 = vsub.s32 0, %v299_v11  ;;  %v295_v22 = vld [vmem:[%s750_s4] sm:$0x7]  ;;  %v321_v23 = vsub.s32 1, %v299_v11  ;;  %v339_v39 = vsub.s32 2, %v299_v11  ;;  %s634_s4 = smov [#allocation14]  }
  0x37   :  { %s370_s21 = sshll.u32 %s634_s4, 4  ;;  %s382_s25 = sshll.u32 %s636_s24, 4  ;;  %s371_s21 = int_to_ptr.vmem [resolvable:$true] %s370_s21  ;;  %s383_s25 = int_to_ptr.vmem [resolvable:$true] %s382_s25 }
  0x38   :  { %v301_v30 = vrot.slane %v295_v22, %v300_v20  ;;  %v322_v32 = vrot.slane %v295_v22, %v321_v23  ;;  %v340_v50 = vrot.slane %v295_v22, %v339_v39  ;;  %s556_s26 = scalar_lea.vmem %s371_s21, 128  ;;  %p561_p7 = scmp.lt.s32.totalorder %s371_s21, %s371_s21 }
  0x39   :  { %437 = vmatpush3.bf16.msra.mxu0 %v471_v3  ;;  %445 = vmatpush3.bf16.msra.mxu1 %v472_v4  ;;  %p557_p6 = scmp.ne.s32.totalorder %s371_s21, %s556_s26  ;;  %p562_p8 = scmp.lt.s32.totalorder %s556_s26, %s556_s26 }
  0x3a   :  { %450 = vmatprep.subr.bf16.mxu0 %v632_v0  ;;  %v94_v9 = vld [vmem:[#allocation2] sm:$0xff]  ;;  %v95_v17 = vld [vmem:[#allocation2 + $0x8] sm:$0xff] }
  0x3b   :  { %v166_v10 = vld [vmem:[#allocation3] sm:$0xff]  ;;  %v167_v19 = vld [vmem:[#allocation3 + $0x8] sm:$0xff]  ;;  %p563_p9 = por %p562_p8, %p561_p7 }
  0x3c   :  { %439 = vmatmul.mubr.msk.bf16.vlgmr.msra.gmra.mxu0 %vm85_vm0, %v473_v5  ;;  %447 = vmatmul.mubr.msk.bf16.vlgmr.msra.gmra.mxu1 %vm85_vm0, %v473_v5  ;;  %v229_v28 = vld [vmem:[#allocation4] sm:$0xff]  ;;  %v230_v35 = vld [vmem:[#allocation4 + $0x8] sm:$0xff] }
  0x3d   :  { %451 = vmatpush3.bf16.msra.mxu0 %v474_v6  ;;  %454 = vmatprep.mubr.msk.bf16.mxu0 %vm633_vm1, %v632_v0  ;;  %p564_p10 = pnand %p563_p9, %p557_p6 }
  0x3e   :  { %452 = vmatprep.subr.bf16.mxu0 %v632_v0 }
  0x41   :  { %453 = vmatpush3.bf16.msra.mxu0 %v475_v7 }
  0x44   :  { %455 = vmatmul.mubr.msk.bf16.vlgmr.msra.gmra.mxu0 %vm85_vm0, %v473_v5 }
  0xfc   :  { %v155_v12 = vpop.f32.mrf.mxu0  ;;  %v218_v14 = vpop.f32.mrf.mxu1 }
  0xfd   :  { %v162_v13 = vadd.f32 %v155_v12, %v94_v9  ;;  %v225_v16 = vadd.f32 %v218_v14, %v166_v10 }
  0xfe   :  { %v440_v15 = vpop.f32.mrf.mxu0  ;;  %v448_v18 = vpop.f32.mrf.mxu1 }
  0xff   :  { %164 = vst.msk [vmem:[#allocation2] sm:$0xff] %vm85_vm0, %v162_v13  ;;  %227 = vst.msk [vmem:[#allocation3] sm:$0xff] %vm85_vm0, %v225_v16 }
 0x100   :  { %v158_v21 = vpop.f32.mrf.mxu0  ;;  %v221_v25 = vpop.f32.mrf.mxu1 }
 0x101   :  { %v163_v24 = vadd.f32 %v158_v21, %v95_v17  ;;  %v226_v27 = vadd.f32 %v221_v25, %v167_v19 }
 0x102   :  { %v441_v26 = vpop.f32.mrf.mxu0  ;;  %v449_v29 = vpop.f32.mrf.mxu1 }
 0x103   :  { %165 = vst.msk [vmem:[#allocation2 + $0x8] sm:$0xff] %vm85_vm0, %v163_v24  ;;  %228 = vst.msk [vmem:[#allocation3 + $0x8] sm:$0xff] %vm85_vm0, %v226_v27 }
 0x104   :  { %v281_v31 = vpop.f32.mrf.mxu0 }
 0x105   :  { %v288_v33 = vadd.f32 %v281_v31, %v229_v28 }
 0x106   :  { %v456_v34 = vpop.f32.mrf.mxu0  ;;  %v296_v36 = vld [vmem:[#allocation2] sm:$0xff]  ;;  %v317_v37 = vld [vmem:[#allocation3] sm:$0xff] }
 0x107   :  { %290 = vst.msk [vmem:[#allocation4] sm:$0xff] %vm85_vm0, %v288_v33  ;;  %v302_v38 = vadd.f32 %v301_v30, %v296_v36  ;;  %v323_v41 = vadd.f32 %v322_v32, %v317_v37 }
 0x108   :  { %v284_v40 = vpop.f32.mrf.mxu0 }
 0x109   :  { %v289_v42 = vadd.f32 %v284_v40, %v230_v35  ;;  %v304_v43 = vmul.f32 0.35355338, %v302_v38  ;;  %v421_v45 = vpack.c.bf16 %v323_v41, %v323_v41 }
 0x10a   :  { %v457_v44 = vpop.f32.mrf.mxu0  ;;  %v297_v46 = vld [vmem:[#allocation2 + $0x8] sm:$0xff]  ;;  %v318_v47 = vld [vmem:[#allocation3 + $0x8] sm:$0xff] }
 0x10b   :  { %291 = vst.msk [vmem:[#allocation4 + $0x8] sm:$0xff] %vm85_vm0, %v289_v42  ;;  %v303_v48 = vadd.f32 %v301_v30, %v297_v46  ;;  %v419_v49 = vpack.c.bf16 %v304_v43, %v304_v43  ;;  %v324_v51 = vadd.f32 %v322_v32, %v318_v47 }
 0x10c   :  { %333 = vst.msk [vmem:[#allocation14] sm:$0xf] %vm314_vm2, %v421_v45 }
 0x10d   :  { %v305_v52 = vmul.f32 0.35355338, %v303_v48  ;;  %315 = vst.msk [vmem:[#allocation13] sm:$0xf] %vm314_vm2, %v419_v49  ;;  %v422_v53 = vpack.c.bf16 %v324_v51, %v324_v51 }
 0x10e   :  { %v335_v54 = vld [vmem:[#allocation4] sm:$0xff] }
 0x10f   :  { %v420_v55 = vpack.c.bf16 %v305_v52, %v305_v52  ;;  %v341_v56 = vadd.f32 %v340_v50, %v335_v54  ;;  %334 = vst.msk [vmem:[#allocation14 + $0x4] sm:$0xf] %vm314_vm2, %v422_v53 }
 0x110   :  { %567 = shalt.err (!%p564_p10)
}
 0x111   :  { %376 = dma.vmem_to_hbm [thread:$0]  %s371_s21, 128, %s752_s6, [#allocation15], %s628_s29, %s628_s29, %s629_s30   ;;  %316 = vst.msk [vmem:[#allocation13 + $0x4] sm:$0xf] %vm314_vm2, %v420_v55  ;;  %v423_v57 = vpack.c.bf16 %v341_v56, %v341_v56 }
 0x112   :  { %s576_s8 = scalar_lea.vmem %s359_s23, 128  ;;  %p581_p12 = scmp.lt.s32.totalorder %s359_s23, %s359_s23 }
 0x113   :  { %p577_p11 = scmp.ne.s32.totalorder %s359_s23, %s576_s8  ;;  %p582_p13 = scmp.lt.s32.totalorder %s576_s8, %s576_s8 }
 0x115   :  { %p583_p0 = por %p582_p13, %p581_p12 }
 0x117   :  { %p584_p1 = pnand %p583_p0, %p577_p11 }
 0x119   :  { %587 = shalt.err (!%p584_p1)
}
 0x11a   :  { %364 = dma.vmem_to_hbm [thread:$0]  %s359_s23, 128, %s751_s5, [#allocation7], %s628_s29, %s628_s29, %s629_s30   ;;  %v336_v58 = vld [vmem:[#allocation4 + $0x8] sm:$0xff]  ;;  %351 = vst.msk [vmem:[#allocation16] sm:$0xf] %vm314_vm2, %v423_v57 }
 0x11b   :  { %v342_v59 = vadd.f32 %v340_v50, %v336_v58  ;;  %s596_s6 = scalar_lea.vmem %s383_s25, 128  ;;  %p601_p3 = scmp.lt.s32.totalorder %s383_s25, %s383_s25 }
 0x11c   :  { %p597_p2 = scmp.ne.s32.totalorder %s383_s25, %s596_s6  ;;  %p602_p4 = scmp.lt.s32.totalorder %s596_s6, %s596_s6 }
 0x11d   :  { %v424_v60 = vpack.c.bf16 %v342_v59, %v342_v59 }
 0x11e   :  { %p603_p5 = por %p602_p4, %p601_p3 }
 0x11f   :  { %352 = vst.msk [vmem:[#allocation16 + $0x4] sm:$0xf] %vm314_vm2, %v424_v60 }
 0x120   :  { %p604_p6 = pnand %p603_p5, %p597_p2 }
 0x122   :  { %607 = shalt.err (!%p604_p6)
}
 0x123   :  { %388 = dma.vmem_to_hbm [thread:$0]  %s383_s25, 128, %s753_s7, [#allocation15], %s628_s29, %s628_s29, %s629_s30  }
 0x124   :  { %622 = dma.done.wait [#allocation7], 128  }
 0x125   :  { %623 = vsyncadd [#allocation7], 4294967168 }
 0x126   :  { %624 = dma.done.wait [#allocation15], 256  }
 0x127   :  { %625 = vsyncadd [#allocation15], 4294967040 }
 0x128   :  { %398 = vsyncpa [#allocation6], 1 }
 0x129   :  { %399 = vsyncpa [#allocation9], 1 }
 0x12a   :  { %400 = vsyncpa [#allocation12], 1 }
 0x12b   :  { %401 = vsyncpa [#allocation7], 1 }
 0x12c   :  { %402 = vsyncpa [#allocation15], 1 }

</bundles_post_ra>
